<compile_context>
chip_gen: v5e
topology: v5e:2x2
jax: 0.10.0
libtpu: 0.0.40
codegen_flags: <defaults>
</compile_context>

<pallas_src>
import jax
import jax.numpy as jnp
from jax.experimental import pallas as pl
from jax.experimental.pallas import tpu as pltpu


def depthwiseconv_pallas(x_nchw, dw_w, dw_b, pw_w, pw_b):
    """x_nchw: (N, C, H, W) f32
       dw_w:   (C, 1, 3, 3)  PyTorch depthwise weight
       dw_b:   (C,)
       pw_w:   (OC, C, 1, 1) PyTorch pointwise weight
       pw_b:   (OC,)
    returns (N, OC, H, W) f32"""
    N, C, H, W = x_nchw.shape
    OC = pw_w.shape[0]
    S = H * W
    # Lane halo: multiple of 128 (so the interior scratch store is tile-aligned)
    # covering the largest flattened tap offset |dh*W + dw| <= W + 1.
    PAD = ((W + 1 + 127) // 128) * 128

    # ---------------- weight-only wrapper prep (tiny, no activation traffic) --
    dwk = dw_w.reshape(C, 9).T.astype(jnp.float32)        # (9, C), k = kh*3+kw
    hh = jnp.arange(H)
    ww = jnp.arange(W)
    masks = []
    for dh in (-1, 0, 1):
        for dwc in (-1, 0, 1):
            vh = (hh + dh >= 0) & (hh + dh < H)
            vw = (ww + dwc >= 0) & (ww + dwc < W)
            masks.append((vh[:, None] & vw[None, :]).reshape(S))
    valid = jnp.stack(masks).astype(jnp.float32)          # (9, S)
    # per-tap depthwise weight with validity mask folded in: (9, C, S)
    wmask = dwk[:, :, None] * valid[:, None, :]

    pww = jnp.transpose(pw_w[:, :, 0, 0]).astype(jnp.float32)   # (C, OC)
    pww3 = pww[:, :, None]                                      # (C, OC, 1)
    # fold depthwise bias into pointwise bias (exact: 1x1 conv is linear)
    pwb_eff = (pw_b + pw_w[:, :, 0, 0] @ dw_b).astype(jnp.float32)
    pwb2 = pwb_eff[:, None]                                     # (OC, 1)

    # activations: NCHW -> (N, C, H*W) is a free reshape (same memory order)
    x_flat = x_nchw.reshape(N, C, S)

    # batch tiling: keep >=2 grid steps (v7x megacore) while packing more batch
    # per block as N grows to amortize per-step pipeline overhead.
    if N < 4:
        bb = 1
    else:
        bb = N // 2
        while N % bb:
            bb -= 1
    grid = (N // bb,)

    # flattened lane shift per tap, ordered like the (kh, kw) weight layout
    deltas = tuple(dh * W + dwc for dh in (-1, 0, 1) for dwc in (-1, 0, 1))

    def kernel(x_ref, wm_ref, pww_ref, pwb_ref, o_ref, xp_ref):
        # x_ref : (bb, C, S)            flattened-spatial input (lane-dense)
        # wm_ref: (9, C, S)             per-tap depthwise weight * valid mask
        # pww_ref: (C, OC, 1)           pointwise weight columns
        # pwb_ref: (OC, 1)              fused bias (pw_b + pw_w @ dw_b)
        # o_ref : (bb, OC, S)           lane-dense output
        # xp_ref: (bb, C, S + 2*PAD)    VMEM scratch with zero lane-halo
        xp_ref[...] = jnp.zeros_like(xp_ref)
        xp_ref[:, :, PAD:PAD + S] = x_ref[...]      # 128-aligned full-tile store
        xp = xp_ref[...]

        wm = wm_ref[...]                            # hoisted weight load

        # depthwise 3x3: 9 lane-shifted multiply-accumulates on the VPU
        acc = xp[:, :, PAD:PAD + S] * wm[4]         # center tap (dh=dw=0)
        for k, d in enumerate(deltas):
            if d == 0:
                continue
            acc = acc + xp[:, :, PAD + d:PAD + d + S] * wm[k]

        # channel_shuffle(groups == C) is the identity permutation.

        # pointwise 1x1: C broadcast-MACs on the VPU (C/OC too small for MXU)
        pwwv = pww_ref[...]                         # (C, OC, 1)
        out = pwb_ref[...] + acc[:, 0:1, :] * pwwv[0]
        for c in range(1, C):
            out = out + acc[:, c:c + 1, :] * pwwv[c]

        o_ref[...] = out.astype(o_ref.dtype)

    out_flat = pl.pallas_call(
        kernel,
        out_shape=jax.ShapeDtypeStruct((N, OC, S), jnp.float32),
        grid_spec=pltpu.PrefetchScalarGridSpec(
            num_scalar_prefetch=0,
            grid=grid,
            in_specs=[
                pl.BlockSpec((bb, C, S), lambda n: (n, 0, 0)),
                pl.BlockSpec((9, C, S), lambda n: (0, 0, 0)),
                pl.BlockSpec((C, OC, 1), lambda n: (0, 0, 0)),
                pl.BlockSpec((OC, 1), lambda n: (0, 0)),
            ],
            out_specs=pl.BlockSpec((bb, OC, S), lambda n: (n, 0, 0)),
            scratch_shapes=[pltpu.VMEM((bb, C, S + 2 * PAD), jnp.float32)],
        ),
        compiler_params=pltpu.CompilerParams(
            dimension_semantics=("parallel",),
            vmem_limit_bytes=32 * 1024 * 1024,
        ),
    )(x_flat, wmask, pww3, pwb2)

    # output is already in NC(HW) order -> free reshape back to NCHW
    return out_flat.reshape(N, OC, H, W)


def _reference(x_nchw, dw_w, dw_b, pw_w, pw_b):
    """Pure-JAX reference matching PyTorch semantics."""
    C = x_nchw.shape[1]
    dw = jax.lax.conv_general_dilated(
        x_nchw, dw_w, window_strides=(1, 1), padding=((1, 1), (1, 1)),
        dimension_numbers=("NCHW", "OIHW", "NCHW"), feature_group_count=C)
    dw = dw + dw_b.reshape(1, C, 1, 1)
    # channel_shuffle(dw, groups=C) == identity (channels_per_group == 1)
    pw = jax.lax.conv_general_dilated(
        dw, pw_w, window_strides=(1, 1), padding=((0, 0), (0, 0)),
        dimension_numbers=("NCHW", "OIHW", "NCHW"))
    return pw + pw_b.reshape(1, -1, 1, 1)


if __name__ == "__main__":
    N, IN_CH, OUT_CH, H, W = 2, 4, 8, 16, 16

    key = jax.random.PRNGKey(0)
    k1, k2, k3, k4, k5 = jax.random.split(key, 5)

    x = jax.random.normal(k1, (N, IN_CH, H, W), dtype=jnp.float32)
    dw_w = jax.random.normal(k2, (IN_CH, 1, 3, 3), dtype=jnp.float32) * 0.2
    dw_b = jax.random.normal(k3, (IN_CH,), dtype=jnp.float32) * 0.1
    pw_w = jax.random.normal(k4, (OUT_CH, IN_CH, 1, 1), dtype=jnp.float32) * 0.2
    pw_b = jax.random.normal(k5, (OUT_CH,), dtype=jnp.float32) * 0.1

    out = depthwiseconv_pallas(x, dw_w, dw_b, pw_w, pw_b)
    out = jax.block_until_ready(out)

    ref = _reference(x, dw_w, dw_b, pw_w, pw_b)
    assert out.shape == (N, OUT_CH, H, W)
    assert jnp.allclose(out, ref, atol=1e-4, rtol=1e-4), "mismatch vs reference"

    print("KERNEL_OK")
</pallas_src>

<mosaic_0001>
module attributes {stable_mosaic.version = 11 : i64} {
  func.func @kernel(%arg0: i32, %arg1: memref<1x4x256xf32, #tpu.memory_space<vmem>>, %arg2: memref<9x4x256xf32, #tpu.memory_space<vmem>>, %arg3: memref<4x8x1xf32, #tpu.memory_space<vmem>>, %arg4: memref<8x1xf32, #tpu.memory_space<vmem>>, %arg5: memref<1x8x256xf32, #tpu.memory_space<vmem>>, %arg6: memref<1x4x512xf32, #tpu.memory_space<vmem>>) attributes {dimension_semantics = [#tpu.dimension_semantics<parallel>], iteration_bounds = array<i64: 2>, scalar_prefetch = 0 : i64, scratch_operands = 1 : i64, tpu.core_type = #tpu.core_type<tc>, window_params = [{transform_indices = @transform_0, window_bounds = array<i64: 1, 4, 256>}, {pipeline_mode = #tpu.pipeline_mode<synchronous>, transform_indices = @transform_1, window_bounds = array<i64: 9, 4, 256>}, {pipeline_mode = #tpu.pipeline_mode<synchronous>, transform_indices = @transform_2, window_bounds = array<i64: 4, 8, 1>}, {pipeline_mode = #tpu.pipeline_mode<synchronous>, transform_indices = @transform_3, window_bounds = array<i64: 8, 1>}, {transform_indices = @transform_4, window_bounds = array<i64: 1, 8, 256>}]} {
    %cst = arith.constant 0.000000e+00 : f32
    %0 = vector.broadcast %cst : f32 to vector<1x4x512xf32>
    %c0 = arith.constant 0 : index
    %c0_0 = arith.constant 0 : index
    %c0_1 = arith.constant 0 : index
    %1 = vector.load %arg6[%c0, %c0_0, %c0_1] : memref<1x4x512xf32, #tpu.memory_space<vmem>>, vector<1x4x512xf32>
    tpu.vector_store %arg6[%c0, %c0_0, %c0_1], %0 {strides = array<i32>} : memref<1x4x512xf32, #tpu.memory_space<vmem>>, vector<1x4x512xf32>,
    %c0_2 = arith.constant 0 : index
    %c0_3 = arith.constant 0 : index
    %c0_4 = arith.constant 0 : index
    %2 = vector.load %arg1[%c0_2, %c0_3, %c0_4] : memref<1x4x256xf32, #tpu.memory_space<vmem>>, vector<1x4x256xf32>
    %c0_5 = arith.constant 0 : index
    %c0_6 = arith.constant 0 : index
    %c128 = arith.constant 128 : index
    %3 = vector.load %arg6[%c0_5, %c0_6, %c128] : memref<1x4x512xf32, #tpu.memory_space<vmem>>, vector<1x4x256xf32>
    tpu.vector_store %arg6[%c0_5, %c0_6, %c128], %2 {strides = array<i32>} : memref<1x4x512xf32, #tpu.memory_space<vmem>>, vector<1x4x256xf32>,
    %c0_7 = arith.constant 0 : index
    %c0_8 = arith.constant 0 : index
    %c0_9 = arith.constant 0 : index
    %4 = vector.load %arg6[%c0_7, %c0_8, %c0_9] : memref<1x4x512xf32, #tpu.memory_space<vmem>>, vector<1x4x512xf32>
    %c0_10 = arith.constant 0 : index
    %c0_11 = arith.constant 0 : index
    %c0_12 = arith.constant 0 : index
    %5 = vector.load %arg2[%c0_10, %c0_11, %c0_12] : memref<9x4x256xf32, #tpu.memory_space<vmem>>, vector<9x4x256xf32>
    %6 = vector.extract_strided_slice %4 {offsets = [0, 0, 128], sizes = [1, 4, 256], strides = [1, 1, 1]} : vector<1x4x512xf32> to vector<1x4x256xf32>
    %7 = vector.extract_strided_slice %5 {offsets = [4, 0, 0], sizes = [1, 4, 256], strides = [1, 1, 1]} : vector<9x4x256xf32> to vector<1x4x256xf32>
    %8 = vector.shape_cast %7 : vector<1x4x256xf32> to vector<4x256xf32>
    %9 = vector.shape_cast %8 : vector<4x256xf32> to vector<1x4x256xf32>
    %10 = arith.mulf %6, %9 : vector<1x4x256xf32>
    %11 = vector.extract_strided_slice %4 {offsets = [0, 0, 111], sizes = [1, 4, 256], strides = [1, 1, 1]} : vector<1x4x512xf32> to vector<1x4x256xf32>
    %12 = vector.extract_strided_slice %5 {offsets = [0, 0, 0], sizes = [1, 4, 256], strides = [1, 1, 1]} : vector<9x4x256xf32> to vector<1x4x256xf32>
    %13 = vector.shape_cast %12 : vector<1x4x256xf32> to vector<4x256xf32>
    %14 = vector.shape_cast %13 : vector<4x256xf32> to vector<1x4x256xf32>
    %15 = arith.mulf %11, %14 : vector<1x4x256xf32>
    %16 = arith.addf %10, %15 : vector<1x4x256xf32>
    %17 = vector.extract_strided_slice %4 {offsets = [0, 0, 112], sizes = [1, 4, 256], strides = [1, 1, 1]} : vector<1x4x512xf32> to vector<1x4x256xf32>
    %18 = vector.extract_strided_slice %5 {offsets = [1, 0, 0], sizes = [1, 4, 256], strides = [1, 1, 1]} : vector<9x4x256xf32> to vector<1x4x256xf32>
    %19 = vector.shape_cast %18 : vector<1x4x256xf32> to vector<4x256xf32>
    %20 = vector.shape_cast %19 : vector<4x256xf32> to vector<1x4x256xf32>
    %21 = arith.mulf %17, %20 : vector<1x4x256xf32>
    %22 = arith.addf %16, %21 : vector<1x4x256xf32>
    %23 = vector.extract_strided_slice %4 {offsets = [0, 0, 113], sizes = [1, 4, 256], strides = [1, 1, 1]} : vector<1x4x512xf32> to vector<1x4x256xf32>
    %24 = vector.extract_strided_slice %5 {offsets = [2, 0, 0], sizes = [1, 4, 256], strides = [1, 1, 1]} : vector<9x4x256xf32> to vector<1x4x256xf32>
    %25 = vector.shape_cast %24 : vector<1x4x256xf32> to vector<4x256xf32>
    %26 = vector.shape_cast %25 : vector<4x256xf32> to vector<1x4x256xf32>
    %27 = arith.mulf %23, %26 : vector<1x4x256xf32>
    %28 = arith.addf %22, %27 : vector<1x4x256xf32>
    %29 = vector.extract_strided_slice %4 {offsets = [0, 0, 127], sizes = [1, 4, 256], strides = [1, 1, 1]} : vector<1x4x512xf32> to vector<1x4x256xf32>
    %30 = vector.extract_strided_slice %5 {offsets = [3, 0, 0], sizes = [1, 4, 256], strides = [1, 1, 1]} : vector<9x4x256xf32> to vector<1x4x256xf32>
    %31 = vector.shape_cast %30 : vector<1x4x256xf32> to vector<4x256xf32>
    %32 = vector.shape_cast %31 : vector<4x256xf32> to vector<1x4x256xf32>
    %33 = arith.mulf %29, %32 : vector<1x4x256xf32>
    %34 = arith.addf %28, %33 : vector<1x4x256xf32>
    %35 = vector.extract_strided_slice %4 {offsets = [0, 0, 129], sizes = [1, 4, 256], strides = [1, 1, 1]} : vector<1x4x512xf32> to vector<1x4x256xf32>
    %36 = vector.extract_strided_slice %5 {offsets = [5, 0, 0], sizes = [1, 4, 256], strides = [1, 1, 1]} : vector<9x4x256xf32> to vector<1x4x256xf32>
    %37 = vector.shape_cast %36 : vector<1x4x256xf32> to vector<4x256xf32>
    %38 = vector.shape_cast %37 : vector<4x256xf32> to vector<1x4x256xf32>
    %39 = arith.mulf %35, %38 : vector<1x4x256xf32>
    %40 = arith.addf %34, %39 : vector<1x4x256xf32>
    %41 = vector.extract_strided_slice %4 {offsets = [0, 0, 143], sizes = [1, 4, 256], strides = [1, 1, 1]} : vector<1x4x512xf32> to vector<1x4x256xf32>
    %42 = vector.extract_strided_slice %5 {offsets = [6, 0, 0], sizes = [1, 4, 256], strides = [1, 1, 1]} : vector<9x4x256xf32> to vector<1x4x256xf32>
    %43 = vector.shape_cast %42 : vector<1x4x256xf32> to vector<4x256xf32>
    %44 = vector.shape_cast %43 : vector<4x256xf32> to vector<1x4x256xf32>
    %45 = arith.mulf %41, %44 : vector<1x4x256xf32>
    %46 = arith.addf %40, %45 : vector<1x4x256xf32>
    %47 = vector.extract_strided_slice %4 {offsets = [0, 0, 144], sizes = [1, 4, 256], strides = [1, 1, 1]} : vector<1x4x512xf32> to vector<1x4x256xf32>
    %48 = vector.extract_strided_slice %5 {offsets = [7, 0, 0], sizes = [1, 4, 256], strides = [1, 1, 1]} : vector<9x4x256xf32> to vector<1x4x256xf32>
    %49 = vector.shape_cast %48 : vector<1x4x256xf32> to vector<4x256xf32>
    %50 = vector.shape_cast %49 : vector<4x256xf32> to vector<1x4x256xf32>
    %51 = arith.mulf %47, %50 : vector<1x4x256xf32>
    %52 = arith.addf %46, %51 : vector<1x4x256xf32>
    %53 = vector.extract_strided_slice %4 {offsets = [0, 0, 145], sizes = [1, 4, 256], strides = [1, 1, 1]} : vector<1x4x512xf32> to vector<1x4x256xf32>
    %54 = vector.extract_strided_slice %5 {offsets = [8, 0, 0], sizes = [1, 4, 256], strides = [1, 1, 1]} : vector<9x4x256xf32> to vector<1x4x256xf32>
    %55 = vector.shape_cast %54 : vector<1x4x256xf32> to vector<4x256xf32>
    %56 = vector.shape_cast %55 : vector<4x256xf32> to vector<1x4x256xf32>
    %57 = arith.mulf %53, %56 : vector<1x4x256xf32>
    %58 = arith.addf %52, %57 : vector<1x4x256xf32>
    %c0_13 = arith.constant 0 : index
    %c0_14 = arith.constant 0 : index
    %c0_15 = arith.constant 0 : index
    %59 = vector.load %arg3[%c0_13, %c0_14, %c0_15] : memref<4x8x1xf32, #tpu.memory_space<vmem>>, vector<4x8x1xf32>
    %c0_16 = arith.constant 0 : index
    %c0_17 = arith.constant 0 : index
    %60 = vector.load %arg4[%c0_16, %c0_17] : memref<8x1xf32, #tpu.memory_space<vmem>>, vector<8x1xf32>
    %61 = vector.extract_strided_slice %58 {offsets = [0, 0, 0], sizes = [1, 1, 256], strides = [1, 1, 1]} : vector<1x4x256xf32> to vector<1x1x256xf32>
    %62 = vector.extract_strided_slice %59 {offsets = [0, 0, 0], sizes = [1, 8, 1], strides = [1, 1, 1]} : vector<4x8x1xf32> to vector<1x8x1xf32>
    %63 = vector.shape_cast %62 : vector<1x8x1xf32> to vector<8x1xf32>
    %64 = vector.shape_cast %63 : vector<8x1xf32> to vector<1x8x1xf32>
    %65 = vector.broadcast %61 : vector<1x1x256xf32> to vector<1x8x256xf32>
    %66 = vector.broadcast %64 : vector<1x8x1xf32> to vector<1x8x256xf32>
    %67 = arith.mulf %65, %66 : vector<1x8x256xf32>
    %68 = vector.shape_cast %60 : vector<8x1xf32> to vector<1x8x1xf32>
    %69 = vector.broadcast %68 : vector<1x8x1xf32> to vector<1x8x256xf32>
    %70 = arith.addf %69, %67 : vector<1x8x256xf32>
    %71 = vector.extract_strided_slice %58 {offsets = [0, 1, 0], sizes = [1, 1, 256], strides = [1, 1, 1]} : vector<1x4x256xf32> to vector<1x1x256xf32>
    %72 = vector.extract_strided_slice %59 {offsets = [1, 0, 0], sizes = [1, 8, 1], strides = [1, 1, 1]} : vector<4x8x1xf32> to vector<1x8x1xf32>
    %73 = vector.shape_cast %72 : vector<1x8x1xf32> to vector<8x1xf32>
    %74 = vector.shape_cast %73 : vector<8x1xf32> to vector<1x8x1xf32>
    %75 = vector.broadcast %71 : vector<1x1x256xf32> to vector<1x8x256xf32>
    %76 = vector.broadcast %74 : vector<1x8x1xf32> to vector<1x8x256xf32>
    %77 = arith.mulf %75, %76 : vector<1x8x256xf32>
    %78 = arith.addf %70, %77 : vector<1x8x256xf32>
    %79 = vector.extract_strided_slice %58 {offsets = [0, 2, 0], sizes = [1, 1, 256], strides = [1, 1, 1]} : vector<1x4x256xf32> to vector<1x1x256xf32>
    %80 = vector.extract_strided_slice %59 {offsets = [2, 0, 0], sizes = [1, 8, 1], strides = [1, 1, 1]} : vector<4x8x1xf32> to vector<1x8x1xf32>
    %81 = vector.shape_cast %80 : vector<1x8x1xf32> to vector<8x1xf32>
    %82 = vector.shape_cast %81 : vector<8x1xf32> to vector<1x8x1xf32>
    %83 = vector.broadcast %79 : vector<1x1x256xf32> to vector<1x8x256xf32>
    %84 = vector.broadcast %82 : vector<1x8x1xf32> to vector<1x8x256xf32>
    %85 = arith.mulf %83, %84 : vector<1x8x256xf32>
    %86 = arith.addf %78, %85 : vector<1x8x256xf32>
    %87 = vector.extract_strided_slice %58 {offsets = [0, 3, 0], sizes = [1, 1, 256], strides = [1, 1, 1]} : vector<1x4x256xf32> to vector<1x1x256xf32>
    %88 = vector.extract_strided_slice %59 {offsets = [3, 0, 0], sizes = [1, 8, 1], strides = [1, 1, 1]} : vector<4x8x1xf32> to vector<1x8x1xf32>
    %89 = vector.shape_cast %88 : vector<1x8x1xf32> to vector<8x1xf32>
    %90 = vector.shape_cast %89 : vector<8x1xf32> to vector<1x8x1xf32>
    %91 = vector.broadcast %87 : vector<1x1x256xf32> to vector<1x8x256xf32>
    %92 = vector.broadcast %90 : vector<1x8x1xf32> to vector<1x8x256xf32>
    %93 = arith.mulf %91, %92 : vector<1x8x256xf32>
    %94 = arith.addf %86, %93 : vector<1x8x256xf32>
    %c0_18 = arith.constant 0 : index
    %c0_19 = arith.constant 0 : index
    %c0_20 = arith.constant 0 : index
    %95 = vector.load %arg5[%c0_18, %c0_19, %c0_20] : memref<1x8x256xf32, #tpu.memory_space<vmem>>, vector<1x8x256xf32>
    tpu.vector_store %arg5[%c0_18, %c0_19, %c0_20], %94 {strides = array<i32>} : memref<1x8x256xf32, #tpu.memory_space<vmem>>, vector<1x8x256xf32>,
    return
  }
  func.func @transform_0(%arg0: i32) -> (i32, i32, i32) {
    %c0_i32 = arith.constant 0 : i32
    %c0_i32_0 = arith.constant 0 : i32
    %c0_i32_1 = arith.constant 0 : i32
    return %arg0, %c0_i32, %c0_i32_0 : i32, i32, i32
  }
  func.func @transform_1(%arg0: i32) -> (i32, i32, i32) {
    %c0_i32 = arith.constant 0 : i32
    %c0_i32_0 = arith.constant 0 : i32
    %c0_i32_1 = arith.constant 0 : i32
    %c0_i32_2 = arith.constant 0 : i32
    return %c0_i32, %c0_i32_0, %c0_i32_1 : i32, i32, i32
  }
  func.func @transform_2(%arg0: i32) -> (i32, i32, i32) {
    %c0_i32 = arith.constant 0 : i32
    %c0_i32_0 = arith.constant 0 : i32
    %c0_i32_1 = arith.constant 0 : i32
    %c0_i32_2 = arith.constant 0 : i32
    return %c0_i32, %c0_i32_0, %c0_i32_1 : i32, i32, i32
  }
  func.func @transform_3(%arg0: i32) -> (i32, i32) {
    %c0_i32 = arith.constant 0 : i32
    %c0_i32_0 = arith.constant 0 : i32
    %c0_i32_1 = arith.constant 0 : i32
    return %c0_i32, %c0_i32_0 : i32, i32
  }
  func.func @transform_4(%arg0: i32) -> (i32, i32, i32) {
    %c0_i32 = arith.constant 0 : i32
    %c0_i32_0 = arith.constant 0 : i32
    %c0_i32_1 = arith.constant 0 : i32
    return %arg0, %c0_i32, %c0_i32_0 : i32, i32, i32
  }
}

</mosaic_0001>

<bundles_post_ra>
// kernel: tpu_custom_call.1
= control target key start
LH: loop header
LB: loop body
LE: loop exit
PB: predicated region body
PF: predicated region fallthrough
CT: control target
= control target key end

     0   :  { %9 = vsyncpa [#allocation4], 0  ;;  %s914_s0 = inlined_call_operand.vmem [shape: f32[2,4,256], index: 0, kind: input, shape index: {}]   ;;  %s915_s1 = inlined_call_operand.hbm [shape: f32[9,4,256], index: 1, kind: input, shape index: {}]   ;;  %s916_s2 = inlined_call_operand.vmem [shape: f32[4,8,1], index: 2, kind: input, shape index: {}]   ;;  %s917_s3 = inlined_call_operand.vmem [shape: f32[8,1], index: 3, kind: input, shape index: {}]   ;;  %s918_s4 = inlined_call_operand.hbm [shape: f32[2,8,256], index: 4, kind: output, shape index: {}]  }
   0x1   :  { %10 = vsyncpa [#allocation5], 0 }
   0x2   :  { %12 = vsyncpa [#allocation5 + $0x1], 0  ;;  %s750_s15 = smov 0   ;;  %s752_s16 = smov 0  }
   0x3   :  { %s754_s17 = smov 0   ;;  %s756_s18 = smov 0  }
   0x4 LB: > { %s771_s19 = sadd.s32 4294967295, %s710_s18   ;;  %s533_s20 = sadd.s32 4294967294, %s710_s18   ;;  %s710_s18 = sphi %s756_s18, %s924_s18   ;;  %s706_s17 = sphi %s754_s17, %s923_s17   ;;  %s702_s16 = sphi %s752_s16, %s922_s16   ;;  %s698_s15 = sphi %s750_s15, %s921_s15  }
   0x5   : > { %s775_s21 = sadd.s32 1, %s710_s18   ;;  %s114_s22 = sadd.s32 1, %s706_s17 }
   0x6   : > { %s111_s23 = ssub.s32 %s710_s18, %s775_s21  ;;  %p124_p0 = scmp.ne.s32.totalorder %s706_s17, %s702_s16 }
   0x7   : > { %p112_p1 = scmp.eq.s32.totalorder %s111_s23, 0  ;;  %p125_p2 = scmp.eq.s32.totalorder %s771_s19, 1 }
   0x8   : > { %p130_p3 = scmp.ne.s32.totalorder %s702_s16, %s698_s15  ;;  %p131_p4 = scmp.eq.s32.totalorder %s533_s20, 1 }
   0x9   : > { %s786_s24 = scalar_select %p112_p1, %s706_s17, %s114_s22  }
   0xa   : > { %p788_p5 = por %p125_p2, %p124_p0  ;;  %p792_p6 = por %p131_p4, %p130_p3 }
   0xb   : > { %p534_p7 = scmp.ge.s32.totalorder %s710_s18, 1  ;;  %p138_p8 = scmp.lt.s32.totalorder %s710_s18, 3 }
   0xc   : > { %p563_p9 = scmp.eq.s32.totalorder %s771_s19, 0  ;;  %s149_s29 = sshll.u32 %s915_s1, 4  ;;  %s150_s29 = int_to_ptr.hbm [resolvable:$true] %s149_s29 }
   0xd   : > { %p139_p10 = pnand %p534_p7, %p138_p8  ;;  %s712_s30 = smov [#allocation3]  }
   0xe   : > { %s151_s5 = sshll.u32 %s712_s30, 4  ;;  %s713_s6 = smov 128   ;;  %s152_s5 = int_to_ptr.vmem [resolvable:$true] %s151_s5 }
   0xf   : > { %p555_p11 = pneg %p139_p10  ;;  %s714_s7 = smov 8  }
  0x10   : > { %181 = sbr.rel (%p139_p10) target bundleno = 316 (0x13c), region = 36 }
  0x11   : > { %p556_p12 = pnand %p563_p9, %p555_p11 }
  0x13   : > { %558 = dma.hbm_to_vmem [thread:$0]  (!%p556_p12), %s150_s29, 1152, %s152_s5, [#allocation4], %s713_s6, %s713_s6, %s714_s7  }
  0x15   : > { %689 = dma.done.wait (%p563_p9), [#allocation4], 1152  }
  0x16   : > { %691 = vsyncadd (%p563_p9), [#allocation4], 4294966144  ;;  %v715_v0 = vmov 0.0   ;;  %p208_p13 = scmp.lt.s32.totalorder %s771_s19, 1  ;;  %v221_v1 = vld [vmem:[#allocation3 + $0x10] sm:$0xff]  ;;  %v219_v2 = vld [vmem:[#allocation3] sm:$0xff] }
  0x17   : > { %213 = vst [vmem:[#allocation2] sm:$0xff] %v715_v0  ;;  %s716_s13 = smov 113   ;;  %s717_s14 = smov 111   ;;  %v222_v4 = vld [vmem:[#allocation3 + $0x18] sm:$0xff]  ;;  %v220_v5 = vld [vmem:[#allocation3 + $0x8] sm:$0xff]  ;;  %v722_v14 = vmov 0  }
  0x18   : > { %214 = vst [vmem:[#allocation2 + $0x8] sm:$0xff] %v715_v0  ;;  %s209_s8 = scalar_select %p208_p13, %s771_s19, 1  ;;  %283 = vrot.lane.b32.xlu1 %v221_v1, %s716_s13  ;;  %237 = vrot.lane.b32.xlu0 %v219_v2, %s717_s14  ;;  %vm263_vm0 = vcmask 916480   ;;  %vm240_vm1 = vcmask 908288   ;;  %vm286_vm2 = vcmask 924672   ;;  %vm309_vm3 = vcmask 1039360  }
  0x19   : > { %s718_s20 = smov 127   ;;  %s719_s22 = smov 112   ;;  %613 = vset.pattern.permute.xlu1 %v722_v14  ;;  %612 = vset.pattern.permute.xlu0 %v722_v14  ;;  %v376_v29 = vld [vmem:[%s917_s3] sm:$0xff]  ;;  %v373_v30 = vld [vmem:[%s916_s2 + $0x8] sm:$0xff]  ;;  %v375_v32 = vld [vmem:[%s916_s2 + $0x18] sm:$0xff]  ;;  %vm232_vm4 = vcmask 1043456  }
  0x1a   : > { %s547_s9 = sshll.u32 %s209_s8, 3  ;;  %s720_s23 = smov 17   ;;  %611 = vset.pattern.permute.xlu2 %v722_v14  ;;  %v372_v31 = vld [vmem:[%s916_s2] sm:$0xff]  ;;  %v374_v33 = vld [vmem:[%s916_s2 + $0x10] sm:$0xff]  ;;  %vm255_vm5 = vcmask 138240   ;;  %vm278_vm6 = vcmask 130048  }
  0x1b   : > { %s212_s12 = scalar_lea.vmem %s914_s0, %s547_s9  ;;  %s721_s27 = smov 15   ;;  %v223_v49 = vld [vmem:[#allocation3 + $0x20] sm:$0xff]  ;;  %vm301_vm7 = vcmask 121856   ;;  %vm324_vm8 = vcmask 7168  }
  0x1c   : > { %v215_v3 = vld [vmem:[%s212_s12] sm:$0xff]  ;;  %s723_s28 = smov 16   ;;  %s724_s29 = smov 1  }
  0x1d   : > { %216 = vst [vmem:[#allocation2 + $0x4] sm:$0xff] %v215_v3  ;;  %s664_s10 = scalar_lea.hbm %s918_s4, 32 }
  0x20   : > { %306 = vrot.lane.b32.xlu1 %v222_v4, %s718_s20  ;;  %260 = vrot.lane.b32.xlu0 %v220_v5, %s719_s22 }
  0x24   : > { %v816_v6 = vld [vmem:[#allocation2] sm:$0xff]  ;;  %v821_v7 = vld [vmem:[#allocation2 + $0x8] sm:$0xff] }
  0x25   : > { %339 = vrot.lane.b32.xlu2 %v816_v6, %s716_s13  ;;  %v231_v43 = vrot.slane %v821_v7, 4  ;;  %v230_v44 = vrot.slane %v816_v6, 4 }
  0x27   : > { %v233_v50 = vsel %vm232_vm4, %v230_v44, %v231_v43 }
  0x28   : > { %328 = vrot.lane.b32.xlu0 %v816_v6, %s718_s20  ;;  %330 = vrot.lane.b32.xlu1 %v821_v7, %s718_s20  ;;  %v235_v54 = vmul.f32 %v233_v50, %v223_v49 }
  0x7f   : > { %v340_v34 = vpop.permute.xlu2 %339 }
  0x80   : > { %v343_v1 = vrot.slane %v340_v34, 4 }
  0x8a   : > { %v284_v8 = vpop.permute.xlu1 %283  ;;  %v238_v9 = vpop.permute.xlu0 %237 }
  0x8b   : > { %v285_v10 = vrot.slane %v284_v8, 4  ;;  %v239_v11 = vrot.slane %v238_v9, 4 }
  0x8d   : > { %v291_v12 = vmul.f32 %v285_v10, %v821_v7  ;;  %v245_v13 = vmul.f32 %v239_v11, %v821_v7  ;;  %v241_v23 = vsel %vm240_vm1, %v239_v11, %v238_v9  ;;  %v287_v25 = vsel %vm286_vm2, %v285_v10, %v284_v8 }
  0x8e   : > { %v244_v24 = vmul.f32 %v241_v23, %v816_v6  ;;  %v290_v27 = vmul.f32 %v287_v25, %v816_v6 }
  0x8f   : > { %250 = vrot.lane.b32.xlu2 %v245_v13, %s720_s23  ;;  %296 = vrot.lane.b32.xlu0 %v291_v12, %s721_s27  ;;  %v224_v12 = vld [vmem:[#allocation3 + $0x28] sm:$0xff] }
  0x92   : > { %v307_v15 = vpop.permute.xlu1 %306  ;;  %v261_v16 = vpop.permute.xlu0 %260 }
  0x93   : > { %v308_v17 = vrot.slane %v307_v15, 4  ;;  %v262_v18 = vrot.slane %v261_v16, 4 }
  0x95   : > { %v314_v19 = vmul.f32 %v308_v17, %v821_v7  ;;  %v264_v20 = vsel %vm263_vm0, %v262_v18, %v261_v16  ;;  %v268_v21 = vmul.f32 %v262_v18, %v821_v7  ;;  %v310_v26 = vsel %vm309_vm3, %v308_v17, %v307_v15  ;;  %v225_v17 = vld [vmem:[#allocation3 + $0x30] sm:$0xff] }
  0x96   : > { %v267_v22 = vmul.f32 %v264_v20, %v816_v6  ;;  %v313_v28 = vmul.f32 %v310_v26, %v816_v6 }
  0x97   : > { %273 = vrot.lane.b32.xlu1 %v268_v21, %s723_s28  ;;  %319 = vrot.lane.b32.xlu2 %v314_v19, %s724_s29 }
  0x98   : > { %271 = vrot.lane.b32.xlu0 %v267_v22, %s723_s28 }
  0x9a   : > { %v329_v36 = vpop.permute.xlu0 %328  ;;  %v331_v38 = vpop.permute.xlu1 %330 }
  0x9b   : > { %v332_v58 = vrot.slane %v329_v36, 4  ;;  %v333_v59 = vrot.slane %v331_v38, 4 }
  0x9d   : > { %v334_v3 = vsel %vm232_vm4, %v332_v58, %v333_v59 }
  0x9e   : > { %v335_v13 = vsel %vm309_vm3, %v334_v3, %v331_v38 }
  0x9f   : > { %350 = vrot.lane.b32.xlu1 %v816_v6, %s719_s22  ;;  %248 = vrot.lane.b32.xlu2 %v244_v24, %s720_s23  ;;  %v337_v21 = vmul.f32 %v335_v13, %v224_v12 }
  0xa0   : > { %341 = vrot.lane.b32.xlu0 %v821_v7, %s716_s13 }
  0xa7   : > { %317 = vrot.lane.b32.xlu1 %v313_v28, %s724_s29  ;;  %294 = vrot.lane.b32.xlu2 %v290_v27, %s721_s27  ;;  %v226_v27 = vld [vmem:[#allocation3 + $0x38] sm:$0xff] }
  0xa8   : > { %361 = vrot.lane.b32.xlu0 %v816_v6, %s717_s14 }
  0xaf   : > { %363 = vrot.lane.b32.xlu1 %v821_v7, %s717_s14  ;;  %352 = vrot.lane.b32.xlu2 %v821_v7, %s719_s22  ;;  %s205_s14 = sand.u32 1, %s702_s16   ;;  %s548_s22 = sshll.u32 %s771_s19, 4 }
  0xb0   : > { %393 = vperm.xlu0 %612, %v376_v29   ;;  %s539_s20 = sshll.u32 %s205_s14, 4  ;;  %s457_s28 = scalar_lea.hbm %s918_s4, %s548_s22 }
  0xb1   : > { %s207_s19 = scalar_lea.vmem [#allocation6], %s539_s20  ;;  %s461_s30 = sshll.u32 %s457_s28, 4  ;;  %s462_s30 = int_to_ptr.hbm [resolvable:$true] %s461_s30 }
  0xb2   : > { %s459_s29 = sshll.u32 %s207_s19, 4  ;;  %s446_s5 = scalar_lea.sflag [#allocation5], %s205_s14  ;;  %s460_s29 = int_to_ptr.vmem [resolvable:$true] %s459_s29 }
  0xb3   : > { %s658_s6 = sshra.s32 %s462_s30, 4  ;;  %s659_s6 = int_to_ptr.hbm [resolvable:$true] %s658_s6 }
  0xb4   : > { %s660_s7 = scalar_lea.hbm %s659_s6, 16  ;;  %p665_p3 = scmp.lt.s32.totalorder %s659_s6, %s918_s4 }
  0xb5   : > { %p661_p0 = scmp.ne.s32.totalorder %s659_s6, %s660_s7  ;;  %p666_p4 = scmp.lt.s32.totalorder %s664_s10, %s660_s7 }
  0xb7   : > { %406 = vperm.xlu1 %613, %v373_v30   ;;  %386 = vperm.xlu2 %611, %v372_v31   ;;  %p662_p1 = pnand %p661_p0, %p788_p5  ;;  %p667_p7 = por %p666_p4, %p665_p3 }
  0xb9   : > { %p663_p2 = pneg %p662_p1 }
  0xbb   : > { %p668_p8 = pnand %p667_p7, %p663_p2 }
  0xbf   : > { %436 = vperm.xlu1 %613, %v375_v32   ;;  %421 = vperm.xlu2 %611, %v374_v33   ;;  %v227_v32 = vld [vmem:[#allocation3 + $0x40] sm:$0xff] }
  0xe9   : > { %v251_v35 = vpop.permute.xlu2 %250 }
  0xea   : > { %v253_v46 = vrot.slane %v251_v35, 4 }
  0xf1   : > { %v320_v37 = vpop.permute.xlu2 %319 }
  0xf2   : > { %v322_v6 = vrot.slane %v320_v37, 4 }
  0xf9   : > { %v249_v40 = vpop.permute.xlu2 %248 }
  0xfa   : > { %v252_v45 = vrot.slane %v249_v40, 4 }
  0xfc   : > { %v254_v52 = vsel %vm232_vm4, %v252_v45, %v253_v46 }
  0xfd   : > { %v256_v56 = vsel %vm255_vm5, %v249_v40, %v254_v52 }
  0xfe   : > { %v258_v63 = vadd.f32 %v256_v56, %v235_v54 }
 0x101   : > { %v297_v39 = vpop.permute.xlu0 %296  ;;  %v295_v51 = vpop.permute.xlu2 %294 }
 0x102   : > { %v299_v60 = vrot.slane %v297_v39, 4  ;;  %v298_v61 = vrot.slane %v295_v51, 4 }
 0x104   : > { %v300_v4 = vsel %vm232_vm4, %v298_v61, %v299_v60 }
 0x105   : > { %v302_v14 = vsel %vm301_vm7, %v295_v51, %v300_v4 }
 0x109   : > { %v274_v41 = vpop.permute.xlu1 %273  ;;  %v353_v2 = vpop.permute.xlu2 %352 }
 0x10a   : > { %v272_v42 = vpop.permute.xlu0 %271  ;;  %v276_v47 = vrot.slane %v274_v41, 4  ;;  %v355_v9 = vrot.slane %v353_v2, 4 }
 0x10b   : > { %v275_v48 = vrot.slane %v272_v42, 4 }
 0x10d   : > { %v277_v55 = vsel %vm232_vm4, %v275_v48, %v276_v47 }
 0x10e   : > { %v279_v62 = vsel %vm278_vm6, %v272_v42, %v277_v55 }
 0x10f   : > { %v281_v5 = vadd.f32 %v279_v62, %v258_v63 }
 0x111   : > { %v351_v53 = vpop.permute.xlu1 %350  ;;  %v304_v15 = vadd.f32 %v302_v14, %v281_v5  ;;  %v387_v38 = vpop.permute.xlu2 %386 }
 0x112   : > { %v342_v57 = vpop.permute.xlu0 %341  ;;  %v354_v8 = vrot.slane %v351_v53, 4 }
 0x113   : > { %v344_v0 = vrot.slane %v342_v57, 4 }
 0x114   : > { %v356_v22 = vsel %vm232_vm4, %v354_v8, %v355_v9 }
 0x115   : > { %v345_v10 = vsel %vm232_vm4, %v343_v1, %v344_v0  ;;  %v357_v28 = vsel %vm263_vm0, %v356_v22, %v353_v2 }
 0x116   : > { %v346_v18 = vsel %vm286_vm2, %v345_v10, %v342_v57  ;;  %v359_v33 = vmul.f32 %v357_v28, %v226_v27 }
 0x117   : > { %v348_v24 = vmul.f32 %v346_v18, %v225_v17 }
 0x119   : > { %v318_v7 = vpop.permute.xlu1 %317  ;;  %v422_v62 = vpop.permute.xlu2 %421 }
 0x11a   : > { %v321_v11 = vrot.slane %v318_v7, 4  ;;  %v362_v20 = vpop.permute.xlu0 %361 }
 0x11b   : > { %v365_v26 = vrot.slane %v362_v20, 4 }
 0x11c   : > { %v323_v16 = vsel %vm232_vm4, %v321_v11, %v322_v6 }
 0x11d   : > { %v325_v19 = vsel %vm324_vm8, %v318_v7, %v323_v16 }
 0x11e   : > { %v327_v23 = vadd.f32 %v325_v19, %v304_v15 }
 0x120   : > { %v338_v25 = vadd.f32 %v337_v21, %v327_v23 }
 0x121   : > { %v364_v29 = vpop.permute.xlu1 %363 }
 0x122   : > { %v349_v30 = vadd.f32 %v348_v24, %v338_v25  ;;  %v366_v31 = vrot.slane %v364_v29, 4  ;;  %v394_v51 = vpop.permute.xlu0 %393 }
 0x124   : > { %v367_v34 = vsel %vm232_vm4, %v365_v26, %v366_v31  ;;  %v360_v36 = vadd.f32 %v359_v33, %v349_v30 }
 0x125   : > { %v368_v35 = vsel %vm240_vm1, %v367_v34, %v364_v29 }
 0x126   : > { %v370_v37 = vmul.f32 %v368_v35, %v227_v32 }
 0x128   : > { %v371_v39 = vadd.f32 %v370_v37, %v360_v36 }
 0x129   : > { %v407_v40 = vpop.permute.xlu1 %406 }
 0x12a   : > { %v378_v41 = vperm.slane %v371_v39, 0  ;;  %v379_v42 = vperm.slane %v371_v39, 4  ;;  %v398_v43 = vperm.slane %v371_v39, 1  ;;  %v399_v44 = vperm.slane %v371_v39, 5 }
 0x12b   : > { %v413_v45 = vperm.slane %v371_v39, 2  ;;  %v414_v46 = vperm.slane %v371_v39, 6  ;;  %v428_v52 = vperm.slane %v371_v39, 3  ;;  %v429_v53 = vperm.slane %v371_v39, 7 }
 0x12c   : > { %v382_v47 = vperm.slane %v378_v41, 0  ;;  %v383_v48 = vperm.slane %v379_v42, 0  ;;  %v402_v49 = vperm.slane %v398_v43, 1  ;;  %v403_v50 = vperm.slane %v399_v44, 1 }
 0x12d   : > { %v417_v56 = vperm.slane %v413_v45, 2  ;;  %v418_v57 = vperm.slane %v414_v46, 2  ;;  %v432_v0 = vperm.slane %v428_v52, 3  ;;  %v433_v1 = vperm.slane %v429_v53, 3 }
 0x12e   : > { %v389_v54 = vmul.f32 %v387_v38, %v382_v47  ;;  %v390_v55 = vmul.f32 %v387_v38, %v383_v48  ;;  %v409_v58 = vmul.f32 %v407_v40, %v402_v49  ;;  %v410_v59 = vmul.f32 %v407_v40, %v403_v50 }
 0x12f   : > { %v424_v2 = vmul.f32 %v422_v62, %v417_v56  ;;  %v425_v3 = vmul.f32 %v422_v62, %v418_v57 }
 0x130   : > { %v396_v60 = vadd.f32 %v394_v51, %v389_v54  ;;  %v397_v61 = vadd.f32 %v394_v51, %v390_v55 }
 0x131   : > { %v437_v63 = vpop.permute.xlu1 %436 }
 0x132   : > { %v411_v4 = vadd.f32 %v409_v58, %v396_v60  ;;  %v412_v5 = vadd.f32 %v410_v59, %v397_v61  ;;  %v439_v8 = vmul.f32 %v437_v63, %v432_v0  ;;  %v440_v9 = vmul.f32 %v437_v63, %v433_v1 }
 0x134   : > { %v426_v6 = vadd.f32 %v424_v2, %v411_v4  ;;  %v427_v7 = vadd.f32 %v425_v3, %v412_v5 }
 0x136   : > { %v441_v10 = vadd.f32 %v439_v8, %v426_v6  ;;  %v442_v11 = vadd.f32 %v440_v9, %v427_v7 }
 0x138   : > { %443 = vst [vmem:[%s207_s19] sm:$0xff] %v441_v10 }
 0x139   : > { %444 = vst [vmem:[%s207_s19 + $0x8] sm:$0xff] %v442_v11 }
 0x13a   : > { %671 = shalt.err (!%p668_p8)
}
 0x13b   : > { %553 = dma.vmem_to_hbm [thread:$0]  (%p788_p5), %s460_s29, 256, %s462_s30, %s446_s5  }
 0x13c PF: > { %p565_p9 = scmp.ge.s32.totalorder %s710_s18, 2  ;;  %s473_s13 = sand.u32 1, %s698_s15  }
 0x13d   : > { %s474_s14 = scalar_lea.sflag [#allocation5], %s473_s13 }
 0x13e   : > { %p560_p10 = pnand %p565_p9, %p792_p6 }
 0x140   : > { %p561_p11 = pneg %p560_p10 }
 0x142   : > { %693 = dma.done.wait (%p561_p11), %s474_s14, 256  }
 0x143   : > { %695 = vsyncadd (%p561_p11), %s474_s14, 4294967040  ;;  %p15_p12 = scmp.ge.s32.totalorder %s775_s21, 4   ;;  %s921_s15 = smov %s702_s16 }
 0x144   : > { %s922_s16 = smov %s706_s17  ;;  %s923_s17 = smov %s786_s24 }
 0x145   : > { %s924_s18 = smov %s775_s21  ;;  %17 = sbr.rel (!%p15_p12) target bundleno = 4 (0x4), region = 76 }
 0x14a   :  { %480 = vsyncpa [#allocation4], 1 }
 0x14b   :  { %482 = vsyncpa [#allocation4 + $0x1], 1 }
 0x14c   :  { %483 = vsyncpa [#allocation5], 1 }
 0x14d   :  { %485 = vsyncpa [#allocation5 + $0x1], 1 }

</bundles_post_ra>
